<compile_context>
chip_gen: v7x
topology: tpu7x:2x2x1
jax: 0.10.0
libtpu: 0.0.40
codegen_flags: <defaults>
</compile_context>

<pallas_src>
import jax
import jax.numpy as jnp
from jax.experimental import pallas as pl
from jax.experimental.pallas import tpu as pltpu

N = 20                  # batch
D_IN = 64               # fc1 in_features
D_HID = 16              # fc1 out_features
D_CAT = D_HID + D_IN    # 80 (effective fc2 in_features)
D_OUT = 64              # fc2 out_features


def _fused_mlp_kernel(x_ref, w1_ref, w2_ref, b1_ref, b2_ref, o_ref):
    # Fold fc1 + concat + fc2 into one effective GEMM, entirely in-kernel:
    #   cat([x @ W1 + b1, x]) @ W2 + b2
    # = x @ (W1 @ W2[:16] + W2[16:])  +  (b1 @ W2[:16] + b2)
    # Static slices at row 16 are sublane-aligned (16 % 8 == 0).
    w2a = w2_ref[:D_HID, :]        # (16, 64) — multiplies v1
    w2b = w2_ref[D_HID:, :]        # (64, 64) — multiplies x
    w_eff = jnp.dot(w1_ref[...], w2a, preferred_element_type=jnp.float32) + w2b
    b_eff = jnp.dot(b1_ref[...], w2a, preferred_element_type=jnp.float32) + b2_ref[...]
    # Main GEMM (MXU, f32 accumulate) + bias broadcast (VPU) + sigmoid (EUP).
    # v6e/v7x knob: casting x/w_eff to bf16 here would halve MXU passes but
    # breaks the 1e-5 f32 validation, so it is left off.
    z = jnp.dot(x_ref[...], w_eff, preferred_element_type=jnp.float32) + b_eff
    o_ref[...] = jax.nn.sigmoid(z)


def model_forward(x, w1_t, b1, w2_t, b2, *, block_rows=256):
    """x: (N, 64) f32; w1_t: (64, 16); b1: (1, 16); w2_t: (80, 64); b2: (1, 64).

    Weights are stored transposed (in_features, out_features) so the MXU
    matmuls are plain x @ W.  No wrapper-side math: the fold happens in-kernel.
    """
    n = x.shape[0]
    tm = n if n <= block_rows else block_rows
    grid = (pl.cdiv(n, tm),)

    cost = pl.CostEstimate(
        flops=2 * n * D_IN * D_OUT + 2 * D_IN * D_HID * D_OUT,
        transcendentals=n * D_OUT,
        bytes_accessed=4 * (n * D_IN + D_IN * D_HID + D_CAT * D_OUT
                            + D_HID + D_OUT + n * D_OUT),
    )

    return pl.pallas_call(
        _fused_mlp_kernel,
        out_shape=jax.ShapeDtypeStruct((n, D_OUT), jnp.float32),
        grid=grid,
        in_specs=[
            pl.BlockSpec((tm, D_IN), lambda i: (i, 0)),        # x: tiled over rows
            pl.BlockSpec((D_IN, D_HID), lambda i: (0, 0)),     # W1: VMEM-resident
            pl.BlockSpec((D_CAT, D_OUT), lambda i: (0, 0)),    # W2: VMEM-resident
            pl.BlockSpec((1, D_HID), lambda i: (0, 0)),        # b1
            pl.BlockSpec((1, D_OUT), lambda i: (0, 0)),        # b2
        ],
        out_specs=pl.BlockSpec((tm, D_OUT), lambda i: (i, 0)),
        compiler_params=pltpu.CompilerParams(
            dimension_semantics=("parallel",)),
        cost_estimate=cost,
    )(x, w1_t, w2_t, b1, b2)


def _torch_linear_init(key, fan_in, fan_out):
    """Deterministic init mimicking torch.nn.Linear: U(-1/sqrt(in), 1/sqrt(in)).

    Weight is returned transposed (in_features, out_features); bias as (1, out).
    """
    kw, kb = jax.random.split(key)
    bound = 1.0 / (fan_in ** 0.5)
    w_t = jax.random.uniform(kw, (fan_in, fan_out), jnp.float32, -bound, bound)
    b = jax.random.uniform(kb, (1, fan_out), jnp.float32, -bound, bound)
    return w_t, b


def _reference(x, w1_t, b1, w2_t, b2):
    v1 = x @ w1_t + b1
    v2 = jnp.concatenate([v1, x], axis=1)
    v3 = v2 @ w2_t + b2
    return jax.nn.sigmoid(v3)


if __name__ == "__main__":
    key = jax.random.PRNGKey(0)
    kx, k1, k2 = jax.random.split(key, 3)

    x1 = jax.random.normal(kx, (N, D_IN), jnp.float32)
    w1_t, b1 = _torch_linear_init(k1, D_IN, D_HID)
    w2_t, b2 = _torch_linear_init(k2, D_CAT, D_OUT)

    out = model_forward(x1, w1_t, b1, w2_t, b2)
    out = jax.block_until_ready(out)

    ref = _reference(x1, w1_t, b1, w2_t, b2)
    assert out.shape == (N, D_OUT)
    assert jnp.allclose(out, ref, atol=1e-5, rtol=1e-5), "mismatch vs reference"

    print("KERNEL_OK")
</pallas_src>

<mosaic_0001>
module attributes {stable_mosaic.version = 11 : i64} {
  func.func @_fused_mlp_kernel(%arg0: i32, %arg1: memref<20x64xf32, #tpu.memory_space<vmem>>, %arg2: memref<64x16xf32, #tpu.memory_space<vmem>>, %arg3: memref<80x64xf32, #tpu.memory_space<vmem>>, %arg4: memref<1x16xf32, #tpu.memory_space<vmem>>, %arg5: memref<1x64xf32, #tpu.memory_space<vmem>>, %arg6: memref<20x64xf32, #tpu.memory_space<vmem>>) attributes {dimension_semantics = [#tpu.dimension_semantics<parallel>], iteration_bounds = array<i64: 1>, scalar_prefetch = 0 : i64, scratch_operands = 0 : i64, tpu.core_type = #tpu.core_type<tc>, window_params = [{transform_indices = @transform_0, window_bounds = array<i64: 20, 64>}, {pipeline_mode = #tpu.pipeline_mode<synchronous>, transform_indices = @transform_1, window_bounds = array<i64: 64, 16>}, {pipeline_mode = #tpu.pipeline_mode<synchronous>, transform_indices = @transform_2, window_bounds = array<i64: 80, 64>}, {pipeline_mode = #tpu.pipeline_mode<synchronous>, transform_indices = @transform_3, window_bounds = array<i64: 1, 16>}, {pipeline_mode = #tpu.pipeline_mode<synchronous>, transform_indices = @transform_4, window_bounds = array<i64: 1, 64>}, {transform_indices = @transform_5, window_bounds = array<i64: 20, 64>}]} {
    %c0 = arith.constant 0 : index
    %c0_0 = arith.constant 0 : index
    %0 = vector.load %arg3[%c0, %c0_0] : memref<80x64xf32, #tpu.memory_space<vmem>>, vector<16x64xf32>
    %c16 = arith.constant 16 : index
    %c0_1 = arith.constant 0 : index
    %1 = vector.load %arg3[%c16, %c0_1] : memref<80x64xf32, #tpu.memory_space<vmem>>, vector<64x64xf32>
    %c0_2 = arith.constant 0 : index
    %c0_3 = arith.constant 0 : index
    %2 = vector.load %arg2[%c0_2, %c0_3] : memref<64x16xf32, #tpu.memory_space<vmem>>, vector<64x16xf32>
    %cst = arith.constant dense<0.000000e+00> : vector<64x64xf32>
    %3 = tpu.matmul %2, %0, %cst {dimension_numbers = #tpu.dot_dimension_numbers<[1], [0], [0], [1], [0, 0, 1, 1], [], []>} : vector<64x16xf32>, vector<16x64xf32>, vector<64x64xf32> -> vector<64x64xf32>
    %4 = arith.addf %3, %1 : vector<64x64xf32>
    %c0_4 = arith.constant 0 : index
    %c0_5 = arith.constant 0 : index
    %5 = vector.load %arg4[%c0_4, %c0_5] : memref<1x16xf32, #tpu.memory_space<vmem>>, vector<1x16xf32>
    %cst_6 = arith.constant dense<0.000000e+00> : vector<1x64xf32>
    %6 = tpu.matmul %5, %0, %cst_6 {dimension_numbers = #tpu.dot_dimension_numbers<[1], [0], [0], [1], [0, 0, 1, 1], [], []>} : vector<1x16xf32>, vector<16x64xf32>, vector<1x64xf32> -> vector<1x64xf32>
    %c0_7 = arith.constant 0 : index
    %c0_8 = arith.constant 0 : index
    %7 = vector.load %arg5[%c0_7, %c0_8] : memref<1x64xf32, #tpu.memory_space<vmem>>, vector<1x64xf32>
    %8 = arith.addf %6, %7 : vector<1x64xf32>
    %c0_9 = arith.constant 0 : index
    %c0_10 = arith.constant 0 : index
    %9 = vector.load %arg1[%c0_9, %c0_10] : memref<20x64xf32, #tpu.memory_space<vmem>>, vector<20x64xf32>
    %cst_11 = arith.constant dense<0.000000e+00> : vector<20x64xf32>
    %10 = tpu.matmul %9, %4, %cst_11 {dimension_numbers = #tpu.dot_dimension_numbers<[1], [0], [0], [1], [0, 0, 1, 1], [], []>} : vector<20x64xf32>, vector<64x64xf32>, vector<20x64xf32> -> vector<20x64xf32>
    %11 = vector.broadcast %8 : vector<1x64xf32> to vector<20x64xf32>
    %12 = arith.addf %10, %11 : vector<20x64xf32>
    %13 = arith.negf %12 : vector<20x64xf32>
    %14 = math.exp %13 : vector<20x64xf32>
    %cst_12 = arith.constant 1.000000e+00 : f32
    %15 = vector.broadcast %cst_12 : f32 to vector<20x64xf32>
    %16 = arith.addf %15, %14 : vector<20x64xf32>
    %17 = arith.divf %15, %16 : vector<20x64xf32>
    %c0_13 = arith.constant 0 : index
    %c0_14 = arith.constant 0 : index
    %18 = vector.load %arg6[%c0_13, %c0_14] : memref<20x64xf32, #tpu.memory_space<vmem>>, vector<20x64xf32>
    tpu.vector_store %arg6[%c0_13, %c0_14], %17 {strides = array<i32>} : memref<20x64xf32, #tpu.memory_space<vmem>>, vector<20x64xf32>,
    return
  }
  func.func @transform_0(%arg0: i32) -> (i32, i32) {
    %c0_i32 = arith.constant 0 : i32
    %c0_i32_0 = arith.constant 0 : i32
    return %arg0, %c0_i32 : i32, i32
  }
  func.func @transform_1(%arg0: i32) -> (i32, i32) {
    %c0_i32 = arith.constant 0 : i32
    %c0_i32_0 = arith.constant 0 : i32
    %c0_i32_1 = arith.constant 0 : i32
    return %c0_i32, %c0_i32_0 : i32, i32
  }
  func.func @transform_2(%arg0: i32) -> (i32, i32) {
    %c0_i32 = arith.constant 0 : i32
    %c0_i32_0 = arith.constant 0 : i32
    %c0_i32_1 = arith.constant 0 : i32
    return %c0_i32, %c0_i32_0 : i32, i32
  }
  func.func @transform_3(%arg0: i32) -> (i32, i32) {
    %c0_i32 = arith.constant 0 : i32
    %c0_i32_0 = arith.constant 0 : i32
    %c0_i32_1 = arith.constant 0 : i32
    return %c0_i32, %c0_i32_0 : i32, i32
  }
  func.func @transform_4(%arg0: i32) -> (i32, i32) {
    %c0_i32 = arith.constant 0 : i32
    %c0_i32_0 = arith.constant 0 : i32
    %c0_i32_1 = arith.constant 0 : i32
    return %c0_i32, %c0_i32_0 : i32, i32
  }
  func.func @transform_5(%arg0: i32) -> (i32, i32) {
    %c0_i32 = arith.constant 0 : i32
    %c0_i32_0 = arith.constant 0 : i32
    return %arg0, %c0_i32 : i32, i32
  }
}

</mosaic_0001>

<bundles_post_ra>
// kernel: tpu_custom_call.1
= control target key start
LH: loop header
LB: loop body
LE: loop exit
PB: predicated region body
PF: predicated region fallthrough
CT: control target
= control target key end

     0   :  { %vm39_vm0 = vcmask 130048   ;;  %s662_s0 = inlined_call_operand.vmem [shape: f32[20,64], index: 0, kind: input, shape index: {}]   ;;  %s663_s1 = inlined_call_operand.vmem [shape: f32[64,16], index: 1, kind: input, shape index: {}]   ;;  %s664_s2 = inlined_call_operand.vmem [shape: f32[80,64], index: 2, kind: input, shape index: {}]   ;;  %s665_s3 = inlined_call_operand.vmem [shape: f32[1,16], index: 3, kind: input, shape index: {}]   ;;  %s666_s4 = inlined_call_operand.vmem [shape: f32[1,64], index: 4, kind: input, shape index: {}]   ;;  %s667_s5 = inlined_call_operand.hbm [shape: f32[20,64], index: 5, kind: output, shape index: {}]  }
   0x1   :  { %v21_v0 = vld [vmem:[%s664_s2] sm:$0xff]  ;;  %v22_v1 = vld [vmem:[%s664_s2 + $0x8] sm:$0xff] }
   0x2   :  { %v31_v2 = vld [vmem:[%s663_s1] sm:$0xff]  ;;  %v466_v3 = vpack.c.bf16 %v22_v1, %v21_v0 }
   0x3   :  { %422 = vmatprep.mubr.msk.f32.mxu1 %vm39_vm0, %v31_v2 }
   0x4   :  { %467 = vmatprep.subr.bf16.mxu1 %v466_v3 }
   0x5   :  { %10 = vsyncpa [#allocation3], 0  ;;  %469 = vmatpush3.bf16.msra.mxu1 %v466_v3  ;;  %v32_v4 = vld [vmem:[%s663_s1 + $0x8] sm:$0xff]  ;;  %v33_v5 = vld [vmem:[%s663_s1 + $0x10] sm:$0xff]  ;;  %v527_v11 = vmov 0.0|0.0   ;;  %vm528_vm1 = vmmov 0   ;;  %v247_v47 = vlaneseq }
   0x6   :  { %v34_v6 = vld [vmem:[%s663_s1 + $0x18] sm:$0xff]  ;;  %v35_v7 = vld [vmem:[%s663_s1 + $0x20] sm:$0xff]  ;;  %v36_v8 = vld [vmem:[%s663_s1 + $0x28] sm:$0xff]  ;;  %473 = vmatprep.subr.bf16.mxu0 %v527_v11  ;;  %470 = vmatprep.subr.bf16.mxu1 %v527_v11  ;;  %v529_v12 = vmov 0.0   ;;  %vm251_vm2 = vcmask 523264   ;;  %vm361_vm3 = vcmask 519168  }
   0x7   :  { %v37_v9 = vld [vmem:[%s663_s1 + $0x30] sm:$0xff]  ;;  %v38_v10 = vld [vmem:[%s663_s1 + $0x38] sm:$0xff]  ;;  %v169_v13 = vld [vmem:[%s665_s3] sm:$0x1]  ;;  %457 = vmatprep.mubr.msk.f32.mxu0 %vm528_vm1, %v529_v12  ;;  %v248_v48 = vshrl.u32 %v247_v47, 7 }
   0x8   :  { %423 = vmatmul.mubr.msk.f32.vlgmr.msra.gmra.mrb[0].mxu1 %vm39_vm0, %v32_v4  ;;  %v24_v14 = vld [vmem:[%s664_s2 + $0x18] sm:$0xff]  ;;  %v23_v15 = vld [vmem:[%s664_s2 + $0x10] sm:$0xff]  ;;  %v26_v20 = vld [vmem:[%s664_s2 + $0x28] sm:$0xff] }
   0x9   :  { %425 = vmatprep.mubr.msk.f32.mxu1 %vm39_vm0, %v33_v5  ;;  %472 = vmatpush3.bf16.msra.mxu1 %v466_v3  ;;  %v25_v21 = vld [vmem:[%s664_s2 + $0x20] sm:$0xff]  ;;  %v28_v27 = vld [vmem:[%s664_s2 + $0x38] sm:$0xff]  ;;  %v27_v28 = vld [vmem:[%s664_s2 + $0x30] sm:$0xff]  ;;  %v249_v51 = vsub.s32 0, %v248_v48 }
   0xa   :  { %v30_v34 = vld [vmem:[%s664_s2 + $0x48] sm:$0xff]  ;;  %v29_v35 = vld [vmem:[%s664_s2 + $0x40] sm:$0xff]  ;;  %v246_v44 = vld [vmem:[%s662_s0 + $0x10] sm:$0xf] }
   0xb   :  { %v244_v42 = vld [vmem:[%s662_s0] sm:$0xff]  ;;  %v245_v43 = vld [vmem:[%s662_s0 + $0x8] sm:$0xff]  ;;  %s530_s0 = smov [#allocation2]  }
   0xc   :  { %426 = vmatmul.mubr.msk.f32.gmra.mrb[2].mxu1 %vm39_vm0, %v34_v6  ;;  %v170_v49 = vld [vmem:[%s666_s4] sm:$0x1]  ;;  %s368_s4 = sshll.u32 %s530_s0, 4  ;;  %s369_s4 = int_to_ptr.vmem [resolvable:$true] %s368_s4 }
   0xd   :  { %428 = vmatprep.mubr.msk.f32.mxu1 %vm39_vm0, %v35_v7  ;;  %s503_s11 = scalar_lea.vmem %s369_s4, 384  ;;  %p508_p1 = scmp.lt.s32.totalorder %s369_s4, %s369_s4 }
   0xe   :  { %p504_p0 = scmp.ne.s32.totalorder %s369_s4, %s503_s11  ;;  %p509_p2 = scmp.lt.s32.totalorder %s503_s11, %s503_s11 }
  0x10   :  { %429 = vmatmul.mubr.msk.f32.gmra.mrb[4].mxu1 %vm39_vm0, %v36_v8  ;;  %p510_p3 = por %p509_p2, %p508_p1 }
  0x11   :  { %431 = vmatprep.mubr.msk.f32.mxu1 %vm39_vm0, %v37_v9 }
  0x12   :  { %p511_p4 = pnand %p510_p3, %p504_p0 }
  0x14   :  { %432 = vmatmul.mubr.msk.f32.gmra.mrb[6].mxu1 %vm39_vm0, %v38_v10 }
  0x15   :  { %438 = vmatprep.mubr.msk.f32.mxu1 %vm528_vm1, %v529_v12 }
  0x18   :  { %439 = vmatmul.mubr.msk.f32.vlgmr.msra.gmra.mrb[8].mxu1 %vm39_vm0, %v169_v13 }
  0xdb   :  { %v424_v16 = vpop.f32.mrb[0].mxu1 }
  0xdc   :  { %v136_v17 = vadd.f32 %v424_v16, %v24_v14  ;;  %v130_v18 = vpop.f32.mrb[1].mxu1 }
  0xdd   :  { %v131_v19 = vadd.f32 %v130_v18, %v23_v15 }
  0xdf   :  { %v427_v22 = vpop.f32.mrb[2].mxu1  ;;  %v474_v23 = vpack.c.bf16 %v136_v17, %v131_v19 }
  0xe0   :  { %v146_v24 = vadd.f32 %v427_v22, %v26_v20  ;;  %v140_v25 = vpop.f32.mrb[3].mxu1 }
  0xe1   :  { %v141_v26 = vadd.f32 %v140_v25, %v25_v21  ;;  %475 = vmatpush3.bf16.msra.mxu0 %v474_v23 }
  0xe2   :  { %476 = vmatprep.subr.bf16.mxu0 %v527_v11 }
  0xe3   :  { %v477_v29 = vpack.c.bf16 %v146_v24, %v141_v26  ;;  %v430_v30 = vpop.f32.mrb[4].mxu1 }
  0xe4   :  { %v156_v31 = vadd.f32 %v430_v30, %v28_v27  ;;  %v150_v32 = vpop.f32.mrb[5].mxu1 }
  0xe5   :  { %v151_v33 = vadd.f32 %v150_v32, %v27_v28  ;;  %478 = vmatpush3.bf16.msra.mxu0 %v477_v29 }
  0xe6   :  { %479 = vmatprep.subr.bf16.mxu0 %v527_v11 }
  0xe7   :  { %v480_v36 = vpack.c.bf16 %v156_v31, %v151_v33  ;;  %v433_v37 = vpop.f32.mrb[6].mxu1 }
  0xe8   :  { %v166_v38 = vadd.f32 %v433_v37, %v30_v34  ;;  %v160_v39 = vpop.f32.mrb[7].mxu1 }
  0xe9   :  { %v161_v40 = vadd.f32 %v160_v39, %v29_v35  ;;  %481 = vmatpush3.bf16.msra.mxu0 %v480_v36 }
  0xea   :  { %482 = vmatprep.subr.bf16.mxu0 %v527_v11 }
  0xeb   :  { %v483_v41 = vpack.c.bf16 %v166_v38, %v161_v40  ;;  %v240_v45 = vpop.f32.mrb[8].mxu1 }
  0xec   :  { %v440_v46 = vpop.f32.mrb[9].mxu1  ;;  %v241_v50 = vadd.f32 %v240_v45, %v170_v49 }
  0xed   :  { %484 = vmatpush3.bf16.msra.mxu0 %v483_v41 }
  0xee   :  { %v250_v52 = vrot.slane %v241_v50, %v249_v51 }
  0xf0   :  { %458 = vmatmul.mubr.msk.f32.vlgmr.msra.gmra.mrb[0].mxu0 %vm251_vm2, %v244_v42 }
  0xf1   :  { %460 = vmatprep.mubr.msk.f32.mxu0 %vm528_vm1, %v529_v12 }
  0xf4   :  { %461 = vmatmul.mubr.msk.f32.gmra.mrb[2].mxu0 %vm251_vm2, %v245_v43 }
  0xf5   :  { %463 = vmatprep.mubr.msk.f32.mxu0 %vm528_vm1, %v529_v12 }
  0xf8   :  { %464 = vmatmul.mubr.msk.f32.gmra.mrb[4].mxu0 %vm251_vm2, %v246_v44 }
 0x1c3   :  { %v327_v53 = vpop.f32.mrb[0].mxu0 }
 0x1c4   :  { %v328_v54 = vadd.f32 %v327_v53, %v250_v52  ;;  %v459_v55 = vpop.f32.mrb[1].mxu0 }
 0x1c6   :  { %v391_v56 = vmul.f32 -1.442695, %v328_v54 }
 0x1c7   :  { %v332_v57 = vpop.f32.mrb[2].mxu0 }
 0x1c8   :  { %491 = vpow2.f32 %v391_v56  ;;  %v333_v58 = vadd.f32 %v332_v57, %v250_v52  ;;  %v462_v59 = vpop.f32.mrb[3].mxu0 }
 0x1ca   :  { %v392_v60 = vmul.f32 -1.442695, %v333_v58 }
 0x1cb   :  { %v337_v61 = vpop.f32.mrb[4].mxu0 }
 0x1cc   :  { %493 = vpow2.f32 %v392_v60  ;;  %v338_v62 = vadd.f32 %v337_v61, %v250_v52  ;;  %v465_v63 = vpop.f32.mrb[5].mxu0 }
 0x1ce   :  { %v393_v0 = vmul.f32 -1.442695, %v338_v62 }
 0x1d0   :  { %495 = vpow2.f32 %v393_v0 }
 0x1d2   :  { %v492_v1 = vpop.eup %491 }
 0x1d3   :  { %v350_v2 = vadd.f32 1.0, %v492_v1 }
 0x1d5   :  { %497 = vrcp.f32 %v350_v2 }
 0x1d6   :  { %v494_v3 = vpop.eup %493 }
 0x1d7   :  { %v351_v4 = vadd.f32 1.0, %v494_v3 }
 0x1d9   :  { %499 = vrcp.f32 %v351_v4 }
 0x1da   :  { %v496_v5 = vpop.eup %495 }
 0x1db   :  { %v352_v6 = vadd.f32 1.0, %v496_v5 }
 0x1dd   :  { %501 = vrcp.f32 %v352_v6 }
 0x1df   :  { %v498_v7 = vpop.eup %497 }
 0x1e0   :  { %359 = vst.msk [vmem:[#allocation2] sm:$0xff] %vm251_vm2, %v498_v7 }
 0x1e3   :  { %v500_v8 = vpop.eup %499 }
 0x1e4   :  { %360 = vst.msk [vmem:[#allocation2 + $0x8] sm:$0xff] %vm251_vm2, %v500_v8 }
 0x1e7   :  { %v502_v9 = vpop.eup %501 }
 0x1e8   :  { %362 = vst.msk [vmem:[#allocation2 + $0x10] sm:$0xf] %vm361_vm3, %v502_v9 }
 0x1e9   :  { %514 = shalt.err (!%p511_p4)
}
 0x1ea   :  { %s515_s14 = scalar_lea.hbm %s667_s5, 384 }
 0x1eb   :  { %p516_p5 = scmp.ne.s32.totalorder %s667_s5, %s515_s14  ;;  %p519_p6 = scmp.lt.u32.totalorder %s515_s14, %s667_s5 }
 0x1ed   :  { %p521_p7 = pnand %p519_p6, %p516_p5 }
 0x1ef   :  { %524 = shalt.err (!%p521_p7)
}
 0x1f0   :  { %s531_s18 = smov 128   ;;  %s532_s19 = smov 8  }
 0x1f1   :  { %374 = dma.vmem_to_hbm [thread:$0]  %s369_s4, 384, %s667_s5, [#allocation3], %s531_s18, %s531_s18, %s532_s19  }
 0x1f2   :  { %525 = dma.done.wait [#allocation3], 384  }
 0x1f3   :  { %526 = vsyncadd [#allocation3], 4294966912 }
 0x1f4   :  { %378 = vsyncpa [#allocation3], 1 }

</bundles_post_ra>
